<compile_context>
chip_gen: v6e
topology: v6e:2x2x1
jax: 0.10.0
libtpu: 0.0.40
codegen_flags: <defaults>
</compile_context>

<pallas_src>
import jax
import jax.numpy as jnp
from jax import lax
from jax.experimental import pallas as pl
from jax.experimental.pallas import tpu as pltpu


_LANES = 128
_SUBLANES = 8
# In-kernel compute chunk: 1024 x 128 f32 = 512 KiB per stream — bounds the
# per-op vreg / VMEM-temporary footprint independently of the DMA block size.
_CHUNK_ROWS = 1024
# Below this element count a single fused jnp.mean(|a-b|) beats the
# pallas_call fixed cost (launch + pipeline warm-up).
_PALLAS_MIN_ELEMENTS = 16384


def _device_kind() -> str:
    try:
        return jax.devices()[0].device_kind.lower()
    except Exception:  # pragma: no cover — CPU / interpret fallback
        return ""


def _num_tensorcores() -> int:
    """TensorCores sharing one jax device (megacore).

    v4 / v5p / v7x expose 2 TCs behind one device; v5e / v6e (and unknown
    chips) get 1 so the grid's 'parallel' axis never forces a wasted
    clamp/mask on single-TC parts.
    """
    kind = _device_kind()
    return 2 if any(tag in kind for tag in ("v4", "v5p", "v7")) else 1


def _target_block_rows() -> int:
    """Rows of the (rows, 128) HBM->VMEM streaming block.

    v5e (16 MiB scoped-VMEM default): 4096 rows = 2 MiB/stream -> 12 MiB for
    3 f32 streams double-buffered.  v6e/v7x (32 MiB default): 8192 rows =
    4 MiB/stream -> 24 MiB; the ~0.35 us per-grid-step fixed cost drops below
    10% of the per-step DMA time even at v7x's 3.2 TB/s.
    """
    kind = _device_kind()
    if any(tag in kind for tag in ("v5e", "v5 lite", "v5lite")):
        return 4096
    return 8192


def _make_l1_sum_kernel(n_preds, rows, block_rows, nbc, needs_mask):
    """Kernel computing sum(|pred_t - gt|) for `n_preds` prediction streams
    against one shared gt stream.

    ref order: gt, pred_0..pred_{T-1}, out_0..out_{T-1}
    grid: (n_cores, blocks_per_core); axis 0 "parallel" (megacore), axis 1 the
    streaming reduction over row blocks.  Each out ref is a per-core (8, 128)
    f32 accumulator tile, resident across the whole axis-1 loop.
    """
    assert block_rows % _SUBLANES == 0
    chunk = min(_CHUNK_ROWS, block_rows)
    assert block_rows % chunk == 0
    n_chunks = block_rows // chunk
    folds = chunk // _SUBLANES

    def kernel(*refs):
        g_ref = refs[0]
        pred_refs = refs[1:1 + n_preds]
        out_refs = refs[1 + n_preds:]

        c = pl.program_id(0)
        j = pl.program_id(1)

        # First step of each core's streaming loop: zero its resident
        # (8, 128) accumulator tiles (they live in the output blocks).
        @pl.when(j == 0)
        def _():
            for o in out_refs:
                o[...] = jnp.zeros_like(o)

        zeros = tuple(jnp.zeros((_SUBLANES, _LANES), jnp.float32)
                      for _ in range(n_preds))

        def run(valid_fn):
            # Walk the DMA'd block in `chunk`-row slices: big HBM block
            # (grid-step overhead amortized), small compute chunk (bounded
            # temporaries / spills).
            def body(i, carry):
                off = pl.multiple_of(i * chunk, chunk)
                g = g_ref[pl.ds(off, chunk), :].astype(jnp.float32)
                valid = valid_fn(off)
                new = []
                for t in range(n_preds):
                    d = jnp.abs(
                        pred_refs[t][pl.ds(off, chunk), :].astype(jnp.float32)
                        - g)
                    if valid is not None:
                        d = jnp.where(valid, d, jnp.float32(0.0))
                    # Tile-aligned regroup + major-axis sum: pure VPU adds
                    # into one vreg; no cross-lane work anywhere in-kernel.
                    new.append(carry[t] + jnp.sum(
                        d.reshape(folds, _SUBLANES, _LANES), axis=0))
                return tuple(new)

            part = lax.fori_loop(0, n_chunks, body, zeros)
            for t in range(n_preds):
                out_refs[t][...] += part[t]

        if needs_mask:
            # Only the ragged last block (or the clamped duplicate block a
            # 2-core split can create) pays for iota/compare/select; full
            # blocks take the unmasked path.  A runtime-skipped pl.when body
            # costs nothing on the hot path.
            blk = c * nbc + j
            block_start = blk * block_rows
            is_full = block_start + block_rows <= rows

            @pl.when(is_full)
            def _():
                run(lambda off: None)

            @pl.when(jnp.logical_not(is_full))
            def _():
                row_iota = lax.broadcasted_iota(jnp.int32, (chunk, _LANES), 0)

                def valid_fn(off):
                    return (block_start + off + row_iota) < rows

                run(valid_fn)
        else:
            run(lambda off: None)

    return kernel


def _flatten_lanes(x):
    """Any-shape tensor -> lane-dense (rows, 128) slab, keeping its dtype.

    When x.size is a multiple of 128 (the common case for NCHW dense maps)
    this is a pure metadata reshape — no extra HBM traffic.  Zero padding
    contributes |0 - 0| = 0 to the sums, so the mean stays exact.
    """
    n = x.size
    flat = x.reshape(-1)
    rem = n % _LANES
    if rem:
        flat = jnp.pad(flat, (0, _LANES - rem))
    return flat.reshape(-1, _LANES)


def pallas_l1_sums(gt, *preds, block_rows=None):
    """sum(|pred_t - gt|) over all elements for each pred_t, sharing the gt
    read across all prediction streams.  Returns a tuple of f32 scalars."""
    n_preds = len(preds)
    assert n_preds >= 1
    for pr in preds:
        assert pr.shape == gt.shape, (pr.shape, gt.shape)

    g2 = _flatten_lanes(gt)
    p2s = [_flatten_lanes(pr) for pr in preds]
    rows = g2.shape[0]

    target = int(block_rows) if block_rows is not None else _target_block_rows()
    assert target % _SUBLANES == 0
    assert target <= _CHUNK_ROWS or target % _CHUNK_ROWS == 0

    # Block sizing.
    if rows <= min(target, _CHUNK_ROWS):
        # Single small block: pad the (cheap) slab so the sublane fold divides.
        pad = (-rows) % _SUBLANES
        if pad:
            g2 = jnp.pad(g2, ((0, pad), (0, 0)))
            p2s = [jnp.pad(pp, ((0, pad), (0, 0))) for pp in p2s]
            rows += pad
        blk_rows = rows
    elif rows >= target:
        blk_rows = target
    else:
        blk_rows = _CHUNK_ROWS

    num_blocks = -(-rows // blk_rows)
    n_cores = _num_tensorcores() if num_blocks >= 2 else 1
    nbc = -(-num_blocks // n_cores)                  # blocks per core
    needs_clamp = n_cores * nbc > num_blocks         # odd block count, 2 cores
    needs_mask = (n_cores * nbc * blk_rows) != rows

    if needs_clamp:
        def in_map(c, j):
            # Clamp the (at most one) fully-out-of-range logical block onto
            # the last valid block; its contribution is zeroed by the mask.
            return (jnp.minimum(c * nbc + j, num_blocks - 1), 0)
    else:
        def in_map(c, j):
            return (c * nbc + j, 0)

    in_spec = pl.BlockSpec((blk_rows, _LANES), in_map)
    # Per-core (8,128) partial-sum tile: a full native tile (no sub-(8,128)
    # block-shape risk, no masked partial stores); the cross-lane reduce is a
    # tiny jnp.sum in the wrapper.
    out_spec = pl.BlockSpec((_SUBLANES, _LANES), lambda c, j: (c, 0))

    kernel = _make_l1_sum_kernel(n_preds, rows, blk_rows, nbc, needs_mask)

    itemsize = max([g2.dtype.itemsize] + [pp.dtype.itemsize for pp in p2s])
    buf_bytes = (1 + n_preds) * 2 * blk_rows * _LANES * itemsize
    # Explicit scoped-VMEM limit: double-buffered streams + headroom for
    # f32 temporaries/spills; safe on all of v5e (128 MiB phys), v6e (128 MiB)
    # and v7x (64 MiB per TC).
    vmem_limit = int(min(48 << 20, max(32 << 20, buf_bytes + (16 << 20))))

    outs = pl.pallas_call(
        kernel,
        out_shape=tuple(
            jax.ShapeDtypeStruct((n_cores * _SUBLANES, _LANES), jnp.float32)
            for _ in range(n_preds)),
        grid_spec=pltpu.PrefetchScalarGridSpec(
            num_scalar_prefetch=0,
            grid=(n_cores, nbc),
            in_specs=[in_spec] * (1 + n_preds),
            out_specs=tuple(out_spec for _ in range(n_preds)),
        ),
        compiler_params=pltpu.CompilerParams(
            dimension_semantics=("parallel", "arbitrary"),
            vmem_limit_bytes=vmem_limit),
    )(g2, *p2s)

    # Finish the reduction of the per-core (8,128) partial tiles in JAX.
    return tuple(jnp.sum(o) for o in outs)


def pallas_l1_means(gt, *preds, block_rows=None):
    """mean(|pred_t - gt|) for each pred_t — nn.L1Loss(mean) semantics."""
    sums = pallas_l1_sums(gt, *preds, block_rows=block_rows)
    inv_n = 1.0 / float(gt.size)          # padding contributed 0 to the sums
    return tuple(s * inv_n for s in sums)


def l1_means(gt, *preds, block_rows=None, force_pallas=False):
    """Dispatch: Pallas streaming kernel for real dense maps, plain JAX for
    tiny inputs where pallas_call launch overhead dominates."""
    if force_pallas or gt.size >= _PALLAS_MIN_ELEMENTS:
        return pallas_l1_means(gt, *preds, block_rows=block_rows)
    g32 = gt.astype(jnp.float32)
    return tuple(jnp.mean(jnp.abs(p.astype(jnp.float32) - g32)) for p in preds)


class P:
    """Minimal stand-in for the config object `p`."""

    def __init__(self, intermediate_supervision: bool):
        self.intermediate_supervision = intermediate_supervision


class MultiTaskLoss:
    """JAX/Pallas port of the PyTorch MultiTaskLoss forward pass.

    Every task's loss function is the L1 (mean |pred - gt|) kernel (the
    PyTorch module's loss_ft / self.l1).  When intermediate supervision is
    enabled, the main and intermediate losses of a task are fused into one
    pallas_call that reads gt a single time.
    """

    def __init__(self, p, tasks, loss_weights):
        assert set(tasks) == set(loss_weights.keys())
        self.p = p
        self.tasks = list(tasks)
        self.loss_weights = dict(loss_weights)
        self.loss_ft = {t: (lambda pr, g: l1_means(g, pr)[0]) for t in tasks}

    def __call__(self, pred, gt, tasks):
        inter_on = bool(self.p.intermediate_supervision)
        out = {}
        losses_inter = {}

        for task in tasks:
            if inter_on and task in self.tasks:
                # Fused: one launch, gt read once for both streams.
                main_l, inter_l = l1_means(
                    gt[task], pred[task], pred["inter_preds"][task])
                out[task] = main_l
                losses_inter[task] = inter_l
            else:
                out[task] = self.loss_ft[task](pred[task], gt[task])

        # torch.sum(torch.stack([w_t * out_t])) == weighted scalar sum
        out["total"] = jnp.sum(
            jnp.stack([self.loss_weights[t] * out[t] for t in tasks]))

        if inter_on:
            inter_preds = pred["inter_preds"]
            for t in self.tasks:
                if t not in losses_inter:     # not covered by the fused path
                    (v,) = l1_means(gt[t], inter_preds[t])
                    losses_inter[t] = v
            for k in self.tasks:
                v = losses_inter[k]
                out["inter_%s" % k] = v
                out["total"] = out["total"] + self.loss_weights[k] * v
        return out


if __name__ == "__main__":
    keys = jax.random.split(jax.random.PRNGKey(0), 20)

    def ref_l1(a, b):
        return jnp.mean(jnp.abs(a.astype(jnp.float32) - b.astype(jnp.float32)))

    tasks = ["semseg", "depth"]
    loss_weights = {"semseg": 1.0, "depth": 2.0}

    # --- 1. Small, module-consistent shapes through the full forward pass
    #        (tiny maps take the small-input fallback; semantics identical). --
    pred = {
        "semseg": jax.random.normal(keys[0], (2, 4, 16, 16), dtype=jnp.float32),
        "depth": jax.random.normal(keys[1], (2, 1, 16, 16), dtype=jnp.float32),
        "inter_preds": {
            "semseg": jax.random.normal(keys[2], (2, 4, 16, 16), dtype=jnp.float32),
            "depth": jax.random.normal(keys[3], (2, 1, 16, 16), dtype=jnp.float32),
        },
    }
    gt = {
        "semseg": jax.random.normal(keys[4], (2, 4, 16, 16), dtype=jnp.float32),
        "depth": jax.random.normal(keys[5], (2, 1, 16, 16), dtype=jnp.float32),
    }
    mtl = MultiTaskLoss(P(intermediate_supervision=True), tasks, loss_weights)
    out = mtl(pred, gt, tasks)
    out = jax.tree_util.tree_map(jax.block_until_ready, out)

    ref = {t: ref_l1(pred[t], gt[t]) for t in tasks}
    ref_inter = {t: ref_l1(pred["inter_preds"][t], gt[t]) for t in tasks}
    ref_total = sum(loss_weights[t] * ref[t] for t in tasks) \
        + sum(loss_weights[t] * ref_inter[t] for t in tasks)
    for t in tasks:
        assert jnp.allclose(out[t], ref[t], atol=1e-5), (t, out[t], ref[t])
        assert jnp.allclose(out["inter_%s" % t], ref_inter[t], atol=1e-5)
    assert jnp.allclose(out["total"], ref_total, atol=1e-5)

    # --- 2. Force the Pallas kernel on the same tiny maps (single padded
    #        block, fused main+inter streams sharing one gt read). -----------
    for t in tasks:
        m, mi = pallas_l1_means(gt[t], pred[t], pred["inter_preds"][t])
        m = jax.block_until_ready(m)
        mi = jax.block_until_ready(mi)
        assert jnp.allclose(m, ref[t], rtol=1e-4, atol=1e-5), (t, m, ref[t])
        assert jnp.allclose(mi, ref_inter[t], rtol=1e-4, atol=1e-5), (t, mi)

    # --- 2b. Element count that is not a lane multiple (lane + row padding). -
    odd_p = jax.random.normal(keys[6], (2, 3, 10, 11), dtype=jnp.float32)
    odd_g = jax.random.normal(keys[7], (2, 3, 10, 11), dtype=jnp.float32)
    (odd_m,) = pallas_l1_means(odd_g, odd_p)
    odd_m = jax.block_until_ready(odd_m)
    assert jnp.allclose(odd_m, ref_l1(odd_p, odd_g), rtol=1e-4, atol=1e-5)

    # --- 3. Streaming path with a small block override: multi-block grid,
    #        ragged (masked) last block, megacore split/clamp on 2-TC parts. --
    sgt = jax.random.normal(keys[8], (2, 13, 100, 128), dtype=jnp.float32)
    sp1 = jax.random.normal(keys[9], (2, 13, 100, 128), dtype=jnp.float32)
    sp2 = jax.random.normal(keys[10], (2, 13, 100, 128), dtype=jnp.float32)
    m1, m2 = pallas_l1_means(sgt, sp1, sp2, block_rows=1024)
    m1 = jax.block_until_ready(m1)
    m2 = jax.block_until_ready(m2)
    assert jnp.allclose(m1, ref_l1(sp1, sgt), rtol=1e-4, atol=1e-4), (m1,)
    assert jnp.allclose(m2, ref_l1(sp2, sgt), rtol=1e-4, atol=1e-4), (m2,)

    # --- 4. Chip-tuned default block size: multi-block grid + chunked
    #        in-kernel fori_loop over the large DMA block. --------------------
    bgt = jax.random.normal(keys[11], (4, 18, 160, 128), dtype=jnp.float32)
    bp = jax.random.normal(keys[12], (4, 18, 160, 128), dtype=jnp.float32)
    (bm,) = pallas_l1_means(bgt, bp)
    bm = jax.block_until_ready(bm)
    assert jnp.allclose(bm, ref_l1(bp, bgt), rtol=1e-4, atol=1e-4), (bm,)

    # --- 5. Full forward at shapes above the Pallas threshold (fused
    #        main+inter Pallas launches inside the module). -------------------
    pred_m = {
        "semseg": jax.random.normal(keys[13], (2, 4, 64, 64), dtype=jnp.float32),
        "depth": jax.random.normal(keys[14], (2, 2, 64, 64), dtype=jnp.float32),
        "inter_preds": {
            "semseg": jax.random.normal(keys[15], (2, 4, 64, 64), dtype=jnp.float32),
            "depth": jax.random.normal(keys[16], (2, 2, 64, 64), dtype=jnp.float32),
        },
    }
    gt_m = {
        "semseg": jax.random.normal(keys[17], (2, 4, 64, 64), dtype=jnp.float32),
        "depth": jax.random.normal(keys[18], (2, 2, 64, 64), dtype=jnp.float32),
    }
    out_m = mtl(pred_m, gt_m, tasks)
    out_m = jax.tree_util.tree_map(jax.block_until_ready, out_m)
    ref_m = {t: ref_l1(pred_m[t], gt_m[t]) for t in tasks}
    ref_mi = {t: ref_l1(pred_m["inter_preds"][t], gt_m[t]) for t in tasks}
    ref_mt = sum(loss_weights[t] * ref_m[t] for t in tasks) \
        + sum(loss_weights[t] * ref_mi[t] for t in tasks)
    for t in tasks:
        assert jnp.allclose(out_m[t], ref_m[t], rtol=1e-4, atol=1e-4)
        assert jnp.allclose(out_m["inter_%s" % t], ref_mi[t], rtol=1e-4, atol=1e-4)
    assert jnp.allclose(out_m["total"], ref_mt, rtol=1e-4, atol=1e-4)

    print("KERNEL_OK")
</pallas_src>

<mosaic_0001>
module attributes {stable_mosaic.version = 11 : i64} {
  func.func @kernel(%arg0: i32, %arg1: i32, %arg2: memref<16x128xf32, #tpu.memory_space<vmem>>, %arg3: memref<16x128xf32, #tpu.memory_space<vmem>>, %arg4: memref<16x128xf32, #tpu.memory_space<vmem>>, %arg5: memref<8x128xf32, #tpu.memory_space<vmem>>, %arg6: memref<8x128xf32, #tpu.memory_space<vmem>>) attributes {dimension_semantics = [#tpu.dimension_semantics<parallel>, #tpu.dimension_semantics<arbitrary>], iteration_bounds = array<i64: 1, 1>, scalar_prefetch = 0 : i64, scratch_operands = 0 : i64, tpu.core_type = #tpu.core_type<tc>, window_params = [{transform_indices = @transform_0, window_bounds = array<i64: 16, 128>}, {transform_indices = @transform_1, window_bounds = array<i64: 16, 128>}, {transform_indices = @transform_2, window_bounds = array<i64: 16, 128>}, {transform_indices = @transform_3, window_bounds = array<i64: 8, 128>}, {transform_indices = @transform_4, window_bounds = array<i64: 8, 128>}]} {
    %c0_i32 = arith.constant 0 : i32
    %0 = arith.cmpi eq, %arg1, %c0_i32 : i32
    %1 = arith.extui %0 : i1 to i32
    %c0_i32_0 = arith.constant 0 : i32
    %2 = arith.cmpi ne, %1, %c0_i32_0 : i32
    scf.if %2 {
      %cst_15 = arith.constant 0.000000e+00 : f32
      %29 = vector.broadcast %cst_15 : f32 to vector<8x128xf32>
      %c0_16 = arith.constant 0 : index
      %c0_17 = arith.constant 0 : index
      %30 = vector.load %arg5[%c0_16, %c0_17] : memref<8x128xf32, #tpu.memory_space<vmem>>, vector<8x128xf32>
      tpu.vector_store %arg5[%c0_16, %c0_17], %29 {strides = array<i32>} : memref<8x128xf32, #tpu.memory_space<vmem>>, vector<8x128xf32>,
      %cst_18 = arith.constant 0.000000e+00 : f32
      %31 = vector.broadcast %cst_18 : f32 to vector<8x128xf32>
      %c0_19 = arith.constant 0 : index
      %c0_20 = arith.constant 0 : index
      %32 = vector.load %arg6[%c0_19, %c0_20] : memref<8x128xf32, #tpu.memory_space<vmem>>, vector<8x128xf32>
      tpu.vector_store %arg6[%c0_19, %c0_20], %31 {strides = array<i32>} : memref<8x128xf32, #tpu.memory_space<vmem>>, vector<8x128xf32>,
    } else {
    }
    %cst = arith.constant 0.000000e+00 : f32
    %3 = vector.broadcast %cst : f32 to vector<8x128xf32>
    %cst_1 = arith.constant 0.000000e+00 : f32
    %4 = vector.broadcast %cst_1 : f32 to vector<8x128xf32>
    %c0_i32_2 = arith.constant 0 : i32
    %c16_i32 = arith.constant 16 : i32
    %5 = arith.muli %c0_i32_2, %c16_i32 : i32
    %6 = tpu.assume_multiple %5, 16 : i32
    %7 = arith.index_cast %6 : i32 to index
    %c0 = arith.constant 0 : index
    %8 = vector.load %arg2[%7, %c0] : memref<16x128xf32, #tpu.memory_space<vmem>>, vector<16x128xf32>
    %9 = arith.index_cast %6 : i32 to index
    %c0_3 = arith.constant 0 : index
    %10 = vector.load %arg3[%9, %c0_3] : memref<16x128xf32, #tpu.memory_space<vmem>>, vector<16x128xf32>
    %11 = arith.subf %10, %8 : vector<16x128xf32>
    %12 = math.absf %11 : vector<16x128xf32>
    %13 = vector.shape_cast %12 : vector<16x128xf32> to vector<2x8x128xf32>
    %cst_4 = arith.constant dense<0.000000e+00> : vector<8x128xf32>
    %14 = vector.multi_reduction <add>, %13, %cst_4 [0] : vector<2x8x128xf32> to vector<8x128xf32>
    %15 = arith.addf %3, %14 : vector<8x128xf32>
    %16 = arith.index_cast %6 : i32 to index
    %c0_5 = arith.constant 0 : index
    %17 = vector.load %arg4[%16, %c0_5] : memref<16x128xf32, #tpu.memory_space<vmem>>, vector<16x128xf32>
    %18 = arith.subf %17, %8 : vector<16x128xf32>
    %19 = math.absf %18 : vector<16x128xf32>
    %20 = vector.shape_cast %19 : vector<16x128xf32> to vector<2x8x128xf32>
    %cst_6 = arith.constant dense<0.000000e+00> : vector<8x128xf32>
    %21 = vector.multi_reduction <add>, %20, %cst_6 [0] : vector<2x8x128xf32> to vector<8x128xf32>
    %22 = arith.addf %4, %21 : vector<8x128xf32>
    %c1_i32 = arith.constant 1 : i32
    %c0_7 = arith.constant 0 : index
    %c0_8 = arith.constant 0 : index
    %23 = vector.load %arg5[%c0_7, %c0_8] : memref<8x128xf32, #tpu.memory_space<vmem>>, vector<8x128xf32>
    %24 = arith.addf %23, %15 : vector<8x128xf32>
    %c0_9 = arith.constant 0 : index
    %c0_10 = arith.constant 0 : index
    %25 = vector.load %arg5[%c0_9, %c0_10] : memref<8x128xf32, #tpu.memory_space<vmem>>, vector<8x128xf32>
    tpu.vector_store %arg5[%c0_9, %c0_10], %24 {strides = array<i32>} : memref<8x128xf32, #tpu.memory_space<vmem>>, vector<8x128xf32>,
    %c0_11 = arith.constant 0 : index
    %c0_12 = arith.constant 0 : index
    %26 = vector.load %arg6[%c0_11, %c0_12] : memref<8x128xf32, #tpu.memory_space<vmem>>, vector<8x128xf32>
    %27 = arith.addf %26, %22 : vector<8x128xf32>
    %c0_13 = arith.constant 0 : index
    %c0_14 = arith.constant 0 : index
    %28 = vector.load %arg6[%c0_13, %c0_14] : memref<8x128xf32, #tpu.memory_space<vmem>>, vector<8x128xf32>
    tpu.vector_store %arg6[%c0_13, %c0_14], %27 {strides = array<i32>} : memref<8x128xf32, #tpu.memory_space<vmem>>, vector<8x128xf32>,
    return
  }
  func.func @transform_0(%arg0: i32, %arg1: i32) -> (i32, i32) {
    %c1_i32 = arith.constant 1 : i32
    %0 = arith.muli %arg0, %c1_i32 : i32
    %1 = arith.addi %0, %arg1 : i32
    %c0_i32 = arith.constant 0 : i32
    %c0_i32_0 = arith.constant 0 : i32
    return %1, %c0_i32 : i32, i32
  }
  func.func @transform_1(%arg0: i32, %arg1: i32) -> (i32, i32) {
    %c1_i32 = arith.constant 1 : i32
    %0 = arith.muli %arg0, %c1_i32 : i32
    %1 = arith.addi %0, %arg1 : i32
    %c0_i32 = arith.constant 0 : i32
    %c0_i32_0 = arith.constant 0 : i32
    return %1, %c0_i32 : i32, i32
  }
  func.func @transform_2(%arg0: i32, %arg1: i32) -> (i32, i32) {
    %c1_i32 = arith.constant 1 : i32
    %0 = arith.muli %arg0, %c1_i32 : i32
    %1 = arith.addi %0, %arg1 : i32
    %c0_i32 = arith.constant 0 : i32
    %c0_i32_0 = arith.constant 0 : i32
    return %1, %c0_i32 : i32, i32
  }
  func.func @transform_3(%arg0: i32, %arg1: i32) -> (i32, i32) {
    %c0_i32 = arith.constant 0 : i32
    %c0_i32_0 = arith.constant 0 : i32
    return %arg0, %c0_i32 : i32, i32
  }
  func.func @transform_4(%arg0: i32, %arg1: i32) -> (i32, i32) {
    %c0_i32 = arith.constant 0 : i32
    %c0_i32_0 = arith.constant 0 : i32
    return %arg0, %c0_i32 : i32, i32
  }
}

</mosaic_0001>

<bundles_post_ra>
// kernel: tpu_custom_call.1
= control target key start
LH: loop header
LB: loop body
LE: loop exit
PB: predicated region body
PF: predicated region fallthrough
CT: control target
= control target key end

     0   :  { %10 = vsyncpa [#allocation3], 0  ;;  %s300_s0 = inlined_call_operand.hbm [shape: f32[16,128], index: 0, kind: input, shape index: {}]   ;;  %s301_s1 = inlined_call_operand.hbm [shape: f32[16,128], index: 1, kind: input, shape index: {}]   ;;  %s302_s2 = inlined_call_operand.hbm [shape: f32[16,128], index: 2, kind: input, shape index: {}]   ;;  %s303_s3 = inlined_call_operand.hbm [shape: f32[8,128], index: 3, kind: output, shape index: {0}]   ;;  %s304_s4 = inlined_call_operand.hbm [shape: f32[8,128], index: 4, kind: output, shape index: {1}]  }
   0x1   :  { %11 = vsyncpa [#allocation6], 0 }
   0x2   :  { %12 = vsyncpa [#allocation4], 0 }
   0x3   :  { %13 = vsyncpa [#allocation10], 0  ;;  %s253_s15 = smov [#allocation5]   ;;  %s254_s17 = smov [#allocation2]  }
   0x4   :  { %s39_s16 = sshll.u32 %s253_s15, 4  ;;  %s23_s18 = sshll.u32 %s254_s17, 4  ;;  %s40_s16 = int_to_ptr.vmem [resolvable:$true] %s39_s16  ;;  %s24_s18 = int_to_ptr.vmem [resolvable:$true] %s23_s18 }
   0x5   :  { %s153_s19 = scalar_lea.vmem %s40_s16, 256  ;;  %p158_p1 = scmp.lt.s32.totalorder %s40_s16, %s40_s16 }
   0x6   :  { %p154_p0 = scmp.ne.s32.totalorder %s40_s16, %s153_s19  ;;  %p159_p2 = scmp.lt.s32.totalorder %s153_s19, %s153_s19 }
   0x8   :  { %p160_p3 = por %p159_p2, %p158_p1 }
   0xa   :  { %p161_p4 = pnand %p160_p3, %p154_p0 }
   0xc   :  { %164 = shalt.err (!%p161_p4)
}
   0xd   :  { %s255_s20 = smov 128   ;;  %s256_s21 = smov 8  }
   0xe   :  { %45 = dma.hbm_to_vmem [thread:$0]  %s301_s1, 256, %s40_s16, [#allocation6], %s255_s20, %s255_s20, %s256_s21  }
   0xf   :  { %s173_s24 = scalar_lea.vmem %s24_s18, 256  ;;  %p178_p6 = scmp.lt.s32.totalorder %s24_s18, %s24_s18 }
  0x10   :  { %p174_p5 = scmp.ne.s32.totalorder %s24_s18, %s173_s24  ;;  %p179_p7 = scmp.lt.s32.totalorder %s173_s24, %s173_s24 }
  0x12   :  { %p180_p8 = por %p179_p7, %p178_p6 }
  0x14   :  { %p181_p9 = pnand %p180_p8, %p174_p5 }
  0x16   :  { %184 = shalt.err (!%p181_p9)
}
  0x17   :  { %29 = dma.hbm_to_vmem [thread:$0]  %s300_s0, 256, %s24_s18, [#allocation3], %s255_s20, %s255_s20, %s256_s21  }
  0x18   :  { %s257_s27 = smov [#allocation7]  }
  0x19   :  { %s55_s28 = sshll.u32 %s257_s27, 4  ;;  %s56_s28 = int_to_ptr.vmem [resolvable:$true] %s55_s28 }
  0x1a   :  { %s193_s29 = scalar_lea.vmem %s56_s28, 256  ;;  %p198_p11 = scmp.lt.s32.totalorder %s56_s28, %s56_s28 }
  0x1b   :  { %p194_p10 = scmp.ne.s32.totalorder %s56_s28, %s193_s29  ;;  %p199_p12 = scmp.lt.s32.totalorder %s193_s29, %s193_s29 }
  0x1d   :  { %p200_p13 = por %p199_p12, %p198_p11 }
  0x1f   :  { %p201_p0 = pnand %p200_p13, %p194_p10 }
  0x21   :  { %204 = shalt.err (!%p201_p0)
}
  0x22   :  { %61 = dma.hbm_to_vmem [thread:$0]  %s302_s2, 256, %s56_s28, [#allocation6], %s255_s20, %s255_s20, %s256_s21  }
  0x23   :  { %245 = dma.done.wait [#allocation3], 256  }
  0x24   :  { %246 = vsyncadd [#allocation3], 4294967040 }
  0x25   :  { %247 = dma.done.wait [#allocation6], 512  }
  0x26   :  { %248 = vsyncadd [#allocation6], 4294966784  ;;  %v83_v0 = vld [vmem:[#allocation2] sm:$0xff]  ;;  %v84_v1 = vld [vmem:[#allocation2 + $0x8] sm:$0xff]  ;;  %s258_s0 = smov [#allocation8]   ;;  %s259_s5 = smov [#allocation9]  }
  0x27   :  { %v85_v2 = vld [vmem:[#allocation5] sm:$0xff]  ;;  %v86_v3 = vld [vmem:[#allocation5 + $0x8] sm:$0xff]  ;;  %v93_v5 = vld [vmem:[#allocation7] sm:$0xff]  ;;  %s113_s2 = sshll.u32 %s258_s0, 4  ;;  %s123_s6 = sshll.u32 %s259_s5, 4  ;;  %s114_s2 = int_to_ptr.vmem [resolvable:$true] %s113_s2  ;;  %s124_s6 = int_to_ptr.vmem [resolvable:$true] %s123_s6 }
  0x28   :  { %v87_v4 = vsub.f32 %v85_v2, %v83_v0  ;;  %v94_v6 = vld [vmem:[#allocation7 + $0x8] sm:$0xff]  ;;  %v88_v7 = vsub.f32 %v86_v3, %v84_v1  ;;  %v95_v8 = vsub.f32 %v93_v5, %v83_v0  ;;  %s205_s7 = scalar_lea.vmem %s114_s2, 128  ;;  %p210_p2 = scmp.lt.s32.totalorder %s114_s2, %s114_s2 }
  0x29   :  { %v96_v9 = vsub.f32 %v94_v6, %v84_v1  ;;  %p206_p1 = scmp.ne.s32.totalorder %s114_s2, %s205_s7  ;;  %p211_p3 = scmp.lt.s32.totalorder %s205_s7, %s205_s7 }
  0x2a   :  { %v89_v10 = vand.u32 2147483647, %v87_v4  ;;  %v90_v11 = vand.u32 2147483647, %v88_v7  ;;  %v97_v12 = vand.u32 2147483647, %v95_v8 }
  0x2b   :  { %v98_v13 = vand.u32 2147483647, %v96_v9  ;;  %p212_p4 = por %p211_p3, %p210_p2 }
  0x2c   :  { %v91_v14 = vadd.f32 %v90_v11, %v89_v10 }
  0x2d   :  { %v99_v15 = vadd.f32 %v98_v13, %v97_v12  ;;  %p213_p5 = pnand %p212_p4, %p206_p1 }
  0x2e   :  { %103 = vst [vmem:[#allocation8] sm:$0xff] %v91_v14 }
  0x2f   :  { %106 = vst [vmem:[#allocation9] sm:$0xff] %v99_v15 }
  0x30   :  { %216 = shalt.err (!%p213_p5)
}
  0x31   :  { %116 = dma.vmem_to_hbm [thread:$0]  %s114_s2, 128, %s303_s3, [#allocation4]  }
  0x32   :  { %s225_s10 = scalar_lea.vmem %s124_s6, 128  ;;  %p230_p7 = scmp.lt.s32.totalorder %s124_s6, %s124_s6 }
  0x33   :  { %p226_p6 = scmp.ne.s32.totalorder %s124_s6, %s225_s10  ;;  %p231_p8 = scmp.lt.s32.totalorder %s225_s10, %s225_s10 }
  0x35   :  { %p232_p9 = por %p231_p8, %p230_p7 }
  0x37   :  { %p233_p10 = pnand %p232_p9, %p226_p6 }
  0x39   :  { %236 = shalt.err (!%p233_p10)
}
  0x3a   :  { %126 = dma.vmem_to_hbm [thread:$0]  %s124_s6, 128, %s304_s4, [#allocation10]  }
  0x3b   :  { %249 = dma.done.wait [#allocation4], 128  }
  0x3c   :  { %250 = vsyncadd [#allocation4], 4294967168 }
  0x3d   :  { %251 = dma.done.wait [#allocation10], 128  }
  0x3e   :  { %252 = vsyncadd [#allocation10], 4294967168 }
  0x3f   :  { %133 = vsyncpa [#allocation3], 1 }
  0x40   :  { %134 = vsyncpa [#allocation6], 1 }
  0x41   :  { %135 = vsyncpa [#allocation4], 1 }
  0x42   :  { %136 = vsyncpa [#allocation10], 1 }

</bundles_post_ra>
